<compile_context>
chip_gen: v5e
topology: v5e:2x2
jax: 0.10.0
libtpu: 0.0.40
codegen_flags: <defaults>
</compile_context>

<pallas_src>
import functools

import jax
import jax.numpy as jnp
from jax.experimental import pallas as pl
from jax.experimental.pallas import tpu as pltpu


def _round_up(v, m):
    return (v + m - 1) // m * m


def _pad_to(a, axis, target):
    pad = target - a.shape[axis]
    if pad == 0:
        return a
    widths = [(0, 0)] * a.ndim
    widths[axis] = (0, pad)
    return jnp.pad(a, widths)


def _mlp_kernel(x_ref, w1_ref, b1_ref, w2_ref, b2_ref, o_ref):
    # x_ref : (tm, Din_p)    bf16 tile of input rows   (pipelined, double-buffered)
    # w1_ref: (Din_p, H_p)   bf16 full weight          (VMEM-resident, single copy)
    # b1_ref: (1, H_p)       f32 bias
    # w2_ref: (H_p, Dout_p)  bf16 full weight          (VMEM-resident, single copy)
    # b2_ref: (1, Dout_p)    f32 bias
    # o_ref : (tm, Dout_p)   output tile (lane-dense: Dout_p % 128 == 0)
    h = jnp.dot(x_ref[...], w1_ref[...], preferred_element_type=jnp.float32)
    h = jnp.maximum(h + b1_ref[...], 0.0)                  # f32 epilogue on VPU
    y = jnp.dot(h.astype(w2_ref.dtype), w2_ref[...],
                preferred_element_type=jnp.float32)
    o_ref[...] = (y + b2_ref[...]).astype(o_ref.dtype)


@functools.partial(jax.jit, static_argnames=("tm",))
def mis_mlp_pallas(x, w1, b1, w2, b2, *, tm=256):
    """x: (..., D_in) -> (..., D_out). Fused Linear->ReLU->Linear.

    Weights are stored as (in_features, out_features) — i.e. transposed relative
    to torch's nn.Linear — so the kernel does plain row-major x @ W matmuls.
    """
    orig_shape = x.shape
    out_dtype = x.dtype
    d_in = orig_shape[-1]
    h_dim = w1.shape[1]
    d_out = w2.shape[1]

    x2d = x.reshape(-1, d_in)
    m = x2d.shape[0]

    # Lane-dense feature dims (multiples of 128) and sublane-aligned row count.
    d_in_p = _round_up(d_in, 128)
    h_p = _round_up(h_dim, 128)
    d_out_p = _round_up(d_out, 128)
    m_p = _round_up(m, 8)

    # Row tile: as large as possible for MXU utilisation, but never larger than
    # the (padded) row count; multiple of 8 (sublane).
    tm = _round_up(max(int(tm), 8), 8)
    tm_eff = min(tm, m_p)
    grid = (pl.cdiv(m_p, tm_eff),)

    # bf16 MXU operands; zero padding of features is mathematically inert.
    x_p = _pad_to(_pad_to(x2d.astype(jnp.bfloat16), 1, d_in_p), 0, m_p)
    w1_p = _pad_to(_pad_to(w1.astype(jnp.bfloat16), 0, d_in_p), 1, h_p)
    w2_p = _pad_to(_pad_to(w2.astype(jnp.bfloat16), 0, h_p), 1, d_out_p)
    b1_p = _pad_to(b1.astype(jnp.float32).reshape(1, h_dim), 1, h_p)
    b2_p = _pad_to(b2.astype(jnp.float32).reshape(1, d_out), 1, d_out_p)

    out_itemsize = jnp.dtype(out_dtype).itemsize
    # VMEM: resident weights/biases (1x) + double-buffered x/out tiles + f32 h.
    needed = ((d_in_p * h_p + h_p * d_out_p) * 2        # bf16 weights, 1x
              + (h_p + d_out_p) * 4                     # f32 biases
              + 2 * tm_eff * d_in_p * 2                 # x tile, double-buffered
              + 2 * tm_eff * d_out_p * out_itemsize     # out tile, double-buffered
              + tm_eff * h_p * 4)                       # f32 intermediate h
    vmem_limit = int(min(max(2 * needed, 16 * 2**20), 64 * 2**20))

    cost = pl.CostEstimate(
        flops=2 * m * (d_in * h_dim + h_dim * d_out),
        transcendentals=0,
        bytes_accessed=int(x_p.size * 2 + w1_p.size * 2 + w2_p.size * 2
                           + b1_p.size * 4 + b2_p.size * 4
                           + m_p * d_out_p * out_itemsize),
    )

    # Whole-array, VMEM-resident operands (single copy, no double buffering).
    resident = pl.BlockSpec(memory_space=pltpu.MemorySpace.VMEM)

    out = pl.pallas_call(
        _mlp_kernel,
        out_shape=jax.ShapeDtypeStruct((m_p, d_out_p), out_dtype),
        grid_spec=pltpu.PrefetchScalarGridSpec(
            num_scalar_prefetch=0,
            grid=grid,
            in_specs=[
                pl.BlockSpec((tm_eff, d_in_p), lambda i: (i, 0)),  # x rows (pipelined)
                resident,   # W1
                resident,   # b1
                resident,   # W2
                resident,   # b2
            ],
            out_specs=pl.BlockSpec((tm_eff, d_out_p), lambda i: (i, 0)),
        ),
        compiler_params=pltpu.CompilerParams(
            dimension_semantics=("parallel",),  # shards row-tiles across TCs on v7x
            vmem_limit_bytes=vmem_limit,
        ),
        cost_estimate=cost,
    )(x_p, w1_p, b1_p, w2_p, b2_p)

    # Strip padding, restore leading dims.
    out = out[:m, :d_out]
    return out.reshape(*orig_shape[:-1], d_out)


def init_mlp_params(key, input_dim, hidden_dim, output_dim, dtype=jnp.float32):
    """Deterministic init mimicking nn.Linear's U(-1/sqrt(fan_in), 1/sqrt(fan_in)).

    Weights are stored transposed relative to torch (in_features, out_features)
    so the kernel can do x @ W directly.
    """
    k1, k2, k3, k4 = jax.random.split(key, 4)
    lim1 = 1.0 / (input_dim ** 0.5)
    lim2 = 1.0 / (hidden_dim ** 0.5)
    w1 = jax.random.uniform(k1, (input_dim, hidden_dim), dtype, -lim1, lim1)
    b1 = jax.random.uniform(k2, (hidden_dim,), dtype, -lim1, lim1)
    w2 = jax.random.uniform(k3, (hidden_dim, output_dim), dtype, -lim2, lim2)
    b2 = jax.random.uniform(k4, (output_dim,), dtype, -lim2, lim2)
    return w1, b1, w2, b2


if __name__ == "__main__":
    key = jax.random.PRNGKey(0)
    kx, kp = jax.random.split(key)

    batch, seq = 2, 8
    input_dim, hidden_dim, output_dim = 32, 64, 32

    x = jax.random.normal(kx, (batch, seq, input_dim), dtype=jnp.float32)
    w1, b1, w2, b2 = init_mlp_params(kp, input_dim, hidden_dim, output_dim)

    out = mis_mlp_pallas(x, w1, b1, w2, b2)
    out = jax.block_until_ready(out)

    # Pure-JAX f32 reference.  The kernel uses bf16 MXU operands with f32
    # accumulation, so tolerate bf16-level rounding error.
    ref = jnp.maximum(x @ w1 + b1, 0.0) @ w2 + b2
    assert out.shape == (batch, seq, output_dim)
    assert out.dtype == x.dtype
    max_err = float(jnp.max(jnp.abs(out - ref)))
    assert jnp.allclose(out, ref, atol=2e-2, rtol=2e-2), (
        f"mismatch vs reference (max abs err {max_err})")

    print("KERNEL_OK")
</pallas_src>

<mosaic_0001>
module attributes {stable_mosaic.version = 11 : i64} {
  func.func @_mlp_kernel(%arg0: i32, %arg1: memref<16x128xbf16, #tpu.memory_space<vmem>>, %arg2: memref<128x128xbf16, #tpu.memory_space<vmem>>, %arg3: memref<1x128xf32, #tpu.memory_space<vmem>>, %arg4: memref<128x128xbf16, #tpu.memory_space<vmem>>, %arg5: memref<1x128xf32, #tpu.memory_space<vmem>>, %arg6: memref<16x128xf32, #tpu.memory_space<vmem>>) attributes {dimension_semantics = [#tpu.dimension_semantics<parallel>], iteration_bounds = array<i64: 1>, scalar_prefetch = 0 : i64, scratch_operands = 0 : i64, tpu.core_type = #tpu.core_type<tc>, window_params = [{transform_indices = @transform_0, window_bounds = array<i64: 16, 128>}, {pipeline_mode = #tpu.pipeline_mode<synchronous>, transform_indices = @transform_1, window_bounds = array<i64: 128, 128>}, {pipeline_mode = #tpu.pipeline_mode<synchronous>, transform_indices = @transform_2, window_bounds = array<i64: 1, 128>}, {pipeline_mode = #tpu.pipeline_mode<synchronous>, transform_indices = @transform_3, window_bounds = array<i64: 128, 128>}, {pipeline_mode = #tpu.pipeline_mode<synchronous>, transform_indices = @transform_4, window_bounds = array<i64: 1, 128>}, {transform_indices = @transform_5, window_bounds = array<i64: 16, 128>}]} {
    %c0 = arith.constant 0 : index
    %c0_0 = arith.constant 0 : index
    %0 = vector.load %arg1[%c0, %c0_0] : memref<16x128xbf16, #tpu.memory_space<vmem>>, vector<16x128xbf16>
    %c0_1 = arith.constant 0 : index
    %c0_2 = arith.constant 0 : index
    %1 = vector.load %arg2[%c0_1, %c0_2] : memref<128x128xbf16, #tpu.memory_space<vmem>>, vector<128x128xbf16>
    %cst = arith.constant dense<0.000000e+00> : vector<16x128xf32>
    %2 = tpu.matmul %0, %1, %cst {dimension_numbers = #tpu.dot_dimension_numbers<[1], [0], [0], [1], [0, 0, 1, 1], [], []>} : vector<16x128xbf16>, vector<128x128xbf16>, vector<16x128xf32> -> vector<16x128xf32>
    %c0_3 = arith.constant 0 : index
    %c0_4 = arith.constant 0 : index
    %3 = vector.load %arg3[%c0_3, %c0_4] : memref<1x128xf32, #tpu.memory_space<vmem>>, vector<1x128xf32>
    %4 = vector.broadcast %3 : vector<1x128xf32> to vector<16x128xf32>
    %5 = arith.addf %2, %4 : vector<16x128xf32>
    %cst_5 = arith.constant 0.000000e+00 : f32
    %6 = vector.broadcast %cst_5 : f32 to vector<16x128xf32>
    %7 = arith.maximumf %5, %6 : vector<16x128xf32>
    %8 = arith.truncf %7 : vector<16x128xf32> to vector<16x128xbf16>
    %c0_6 = arith.constant 0 : index
    %c0_7 = arith.constant 0 : index
    %9 = vector.load %arg4[%c0_6, %c0_7] : memref<128x128xbf16, #tpu.memory_space<vmem>>, vector<128x128xbf16>
    %cst_8 = arith.constant dense<0.000000e+00> : vector<16x128xf32>
    %10 = tpu.matmul %8, %9, %cst_8 {dimension_numbers = #tpu.dot_dimension_numbers<[1], [0], [0], [1], [0, 0, 1, 1], [], []>} : vector<16x128xbf16>, vector<128x128xbf16>, vector<16x128xf32> -> vector<16x128xf32>
    %c0_9 = arith.constant 0 : index
    %c0_10 = arith.constant 0 : index
    %11 = vector.load %arg5[%c0_9, %c0_10] : memref<1x128xf32, #tpu.memory_space<vmem>>, vector<1x128xf32>
    %12 = vector.broadcast %11 : vector<1x128xf32> to vector<16x128xf32>
    %13 = arith.addf %10, %12 : vector<16x128xf32>
    %c0_11 = arith.constant 0 : index
    %c0_12 = arith.constant 0 : index
    %14 = vector.load %arg6[%c0_11, %c0_12] : memref<16x128xf32, #tpu.memory_space<vmem>>, vector<16x128xf32>
    tpu.vector_store %arg6[%c0_11, %c0_12], %13 {strides = array<i32>} : memref<16x128xf32, #tpu.memory_space<vmem>>, vector<16x128xf32>,
    return
  }
  func.func @transform_0(%arg0: i32) -> (i32, i32) {
    %c0_i32 = arith.constant 0 : i32
    %c0_i32_0 = arith.constant 0 : i32
    return %arg0, %c0_i32 : i32, i32
  }
  func.func @transform_1(%arg0: i32) -> (i32, i32) {
    %c0_i32 = arith.constant 0 : i32
    %c0_i32_0 = arith.constant 0 : i32
    %c0_i32_1 = arith.constant 0 : i32
    return %c0_i32, %c0_i32_0 : i32, i32
  }
  func.func @transform_2(%arg0: i32) -> (i32, i32) {
    %c0_i32 = arith.constant 0 : i32
    %c0_i32_0 = arith.constant 0 : i32
    %c0_i32_1 = arith.constant 0 : i32
    return %c0_i32, %c0_i32_0 : i32, i32
  }
  func.func @transform_3(%arg0: i32) -> (i32, i32) {
    %c0_i32 = arith.constant 0 : i32
    %c0_i32_0 = arith.constant 0 : i32
    %c0_i32_1 = arith.constant 0 : i32
    return %c0_i32, %c0_i32_0 : i32, i32
  }
  func.func @transform_4(%arg0: i32) -> (i32, i32) {
    %c0_i32 = arith.constant 0 : i32
    %c0_i32_0 = arith.constant 0 : i32
    %c0_i32_1 = arith.constant 0 : i32
    return %c0_i32, %c0_i32_0 : i32, i32
  }
  func.func @transform_5(%arg0: i32) -> (i32, i32) {
    %c0_i32 = arith.constant 0 : i32
    %c0_i32_0 = arith.constant 0 : i32
    return %arg0, %c0_i32 : i32, i32
  }
}

</mosaic_0001>

<bundles_post_ra>
// kernel: mis_mlp_pallas.1
= control target key start
LH: loop header
LB: loop body
LE: loop exit
PB: predicated region body
PF: predicated region fallthrough
CT: control target
= control target key end

     0   :  { %s381_s1 = inlined_call_operand.vmem [shape: bf16[128,128], index: 1, kind: input, shape index: {}]   ;;  %s382_s3 = inlined_call_operand.vmem [shape: bf16[128,128], index: 3, kind: input, shape index: {}]   ;;  %s383_s2 = inlined_call_operand.vmem [shape: f32[1,128], index: 2, kind: input, shape index: {}]   ;;  %s384_s0 = inlined_call_operand.vmem [shape: bf16[16,128], index: 0, kind: input, shape index: {}]   ;;  %s385_s4 = inlined_call_operand.vmem [shape: f32[1,128], index: 4, kind: input, shape index: {}]   ;;  %s386_s5 = inlined_call_operand.vmem [shape: f32[16,128], index: 5, kind: output, shape index: {}]  }
   0x1   :  { %v277_v0 = vld [vmem:[%s381_s1 + $0x38] sm:$0xff]  ;;  %v276_v1 = vld [vmem:[%s381_s1 + $0x30] sm:$0xff]  ;;  %v275_v4 = vld [vmem:[%s381_s1 + $0x28] sm:$0xff] }
   0x2   :  { %96 = vmatpush.bf16.msra.mxu0 %v277_v0  ;;  %v285_v2 = vld [vmem:[%s382_s3 + $0x38] sm:$0xff]  ;;  %v284_v3 = vld [vmem:[%s382_s3 + $0x30] sm:$0xff]  ;;  %v283_v5 = vld [vmem:[%s382_s3 + $0x28] sm:$0xff] }
   0x3   :  { %181 = vmatpush.bf16.msra.mxu1 %v285_v2  ;;  %v274_v6 = vld [vmem:[%s381_s1 + $0x20] sm:$0xff]  ;;  %v273_v8 = vld [vmem:[%s381_s1 + $0x18] sm:$0xff]  ;;  %v272_v9 = vld [vmem:[%s381_s1 + $0x10] sm:$0xff] }
   0x4   :  { %v282_v7 = vld [vmem:[%s382_s3 + $0x20] sm:$0xff]  ;;  %v271_v10 = vld [vmem:[%s381_s1 + $0x8] sm:$0xff]  ;;  %v281_v13 = vld [vmem:[%s382_s3 + $0x18] sm:$0xff] }
   0x5   :  { %v270_v11 = vld [vmem:[%s381_s1] sm:$0xff]  ;;  %v280_v14 = vld [vmem:[%s382_s3 + $0x10] sm:$0xff]  ;;  %v279_v15 = vld [vmem:[%s382_s3 + $0x8] sm:$0xff] }
   0x6   :  { %97 = vmatpush.bf16.msra.mxu0 %v276_v1  ;;  %v269_v12 = vld [vmem:[%s384_s0] sm:$0xff] }
   0x7   :  { %182 = vmatpush.bf16.msra.mxu1 %v284_v3  ;;  %v278_v16 = vld [vmem:[%s382_s3] sm:$0xff] }
   0x8   :  { %v286_v18 = vld [vmem:[%s383_s2] ss:$0 sm:$0xff] }
   0x9   :  { %v287_v25 = vld [vmem:[%s385_s4] ss:$0 sm:$0xff] }
   0xa   :  { %98 = vmatpush.bf16.msra.mxu0 %v275_v4 }
   0xb   :  { %183 = vmatpush.bf16.msra.mxu1 %v283_v5 }
   0xe   :  { %99 = vmatpush.bf16.msra.mxu0 %v274_v6 }
   0xf   :  { %184 = vmatpush.bf16.msra.mxu1 %v282_v7 }
  0x12   :  { %100 = vmatpush.bf16.msra.mxu0 %v273_v8 }
  0x13   :  { %185 = vmatpush.bf16.msra.mxu1 %v281_v13 }
  0x16   :  { %101 = vmatpush.bf16.msra.mxu0 %v272_v9 }
  0x17   :  { %186 = vmatpush.bf16.msra.mxu1 %v280_v14 }
  0x1a   :  { %102 = vmatpush.bf16.msra.mxu0 %v271_v10 }
  0x1b   :  { %187 = vmatpush.bf16.msra.mxu1 %v279_v15 }
  0x1e   :  { %103 = vmatpush.bf16.msra.mxu0 %v270_v11 }
  0x1f   :  { %188 = vmatpush.bf16.msra.mxu1 %v278_v16 }
  0x21   :  { %104 = vmatmul.bf16.vlgmr.msra.gmra.mxu0 %v269_v12 }
  0x9e   :  { %v105_v17 = vpop.f32.mrf.mxu0 }
  0x9f   :  { %v106_v19 = vadd.f32 %v286_v18, %v105_v17 }
  0xa1   :  { %v110_v22 = vmax.f32 %v106_v19, 0.0 }
  0xa6   :  { %v107_v20 = vpop.f32.mrf.mxu0 }
  0xa7   :  { %v108_v21 = vadd.f32 %v286_v18, %v107_v20 }
  0xa9   :  { %v111_v23 = vmax.f32 %v108_v21, 0.0 }
  0xab   :  { %v112_v24 = vpack.c.bf16 %v111_v23, %v110_v22 }
  0xad   :  { %189 = vmatmul.bf16.vlgmr.msra.gmra.mxu1 %v112_v24 }
 0x12a   :  { %v190_v26 = vpop.f32.mrf.mxu1 }
 0x12b   :  { %v191_v27 = vadd.f32 %v287_v25, %v190_v26 }
 0x12d   :  { %195 = vst [vmem:[%s386_s5] sm:$0xff] %v191_v27 }
 0x132   :  { %v192_v28 = vpop.f32.mrf.mxu1 }
 0x133   :  { %v193_v29 = vadd.f32 %v287_v25, %v192_v28 }
 0x135   :  { %196 = vst [vmem:[%s386_s5 + $0x8] sm:$0xff] %v193_v29 }

</bundles_post_ra>
